<compile_context>
chip_gen: v7x
topology: tpu7x:2x2x1
jax: 0.10.0
libtpu: 0.0.40
codegen_flags: <defaults>
</compile_context>

<pallas_src>
import jax
import jax.numpy as jnp
from jax.experimental import pallas as pl
from jax.experimental.pallas import tpu as pltpu

_PCM_SCALE = 32768.0
_PCM_MAX = 32767.0
_PCM_MIN = -32768.0

_SUB = 8     # f32 sublane tile
_LANE = 128  # lane tile


def _pcm16_kernel(x_ref, o_ref):
    x = x_ref[...].astype(jnp.float32)
    # Quantize to the int16 grid and dequantize (pcm_s16le round trip).
    q = jnp.clip(jnp.round(x * _PCM_SCALE), _PCM_MIN, _PCM_MAX)
    o_ref[...] = (q * (1.0 / _PCM_SCALE)).astype(o_ref.dtype)


def _round_up(v, m):
    return ((v + m - 1) // m) * m


def _run_2d(x2d, block, grid, *, vmem_limit_bytes, n_elems):
    """Launch the elementwise pcm16 kernel over a 2-D view with given tiling."""
    if len(grid) == 1:
        index_map = lambda i: (i, 0)
    else:
        index_map = lambda i, j: (i, j)
    itemsize = jnp.dtype(x2d.dtype).itemsize
    return pl.pallas_call(
        _pcm16_kernel,
        out_shape=jax.ShapeDtypeStruct(x2d.shape, x2d.dtype),
        grid=grid,
        in_specs=[pl.BlockSpec(block, index_map)],
        out_specs=pl.BlockSpec(block, index_map),
        compiler_params=pltpu.CompilerParams(
            dimension_semantics=("parallel",) * len(grid),
            vmem_limit_bytes=vmem_limit_bytes,
        ),
        cost_estimate=pl.CostEstimate(
            flops=5 * n_elems,
            transcendentals=0,
            bytes_accessed=2 * n_elems * itemsize,
        ),
    )(x2d)


def codec_augmentation_pcm16(
    x: jax.Array,
    *,
    target_block_bytes: int = 8 << 20,   # ~8 MiB VMEM per (padded) block buffer
    vmem_limit_bytes: int = 48 << 20,
) -> jax.Array:
    """Forward pass of CodecAugmentation(format='pcm16').

    Args:
        x: float32 array of shape (batch, 1, samples). Any sample count is
           accepted; no padding/copy of the input or output is performed.
    Returns:
        x_hat of the same shape/dtype.
    """
    if x.ndim != 3:
        raise ValueError(f"Expected 3D tensor, got {x.ndim}D tensor")
    if x.shape[1] != 1:
        raise ValueError(f"Expected mono audio, got {x.shape[1]} channels")

    b, _, t = x.shape
    n = b * t
    if n == 0:
        return x
    itemsize = jnp.dtype(x.dtype).itemsize

    if n % _LANE == 0:
        # --- Path A: flat lane-dense (rows, 128) slab (bitcast reshape). ---
        rows = n // _LANE
        x2d = x.reshape(rows, _LANE)
        max_rows = max(_SUB, (target_block_bytes // (_LANE * itemsize)) // _SUB * _SUB)
        if rows <= max_rows:
            block_rows = rows
            # >= 2 MiB of data but only one block: split so both v7x TCs work.
            if rows >= 4096:
                cand = _round_up(pl.cdiv(rows, 2), _SUB)
                if cand < rows:
                    block_rows = cand
        else:
            block_rows = max_rows
        grid = (pl.cdiv(rows, block_rows),)
        out2d = _run_2d(x2d, (block_rows, _LANE), grid,
                        vmem_limit_bytes=vmem_limit_bytes, n_elems=n)
    else:
        # --- Path B: (B, T) layout, tile along T; trailing block masked. ---
        x2d = x.reshape(b, t)
        padded_b = _round_up(b, _SUB)
        if padded_b * _LANE * itemsize > target_block_bytes:
            # Extremely large batch: tile the batch axis in multiples of 8.
            block_b = max(_SUB,
                          (target_block_bytes // (_LANE * itemsize)) // _SUB * _SUB)
        else:
            block_b = b
        bb_pad = _round_up(block_b, _SUB)  # VMEM sublane-padded footprint
        max_t = max(_LANE,
                    (target_block_bytes // (bb_pad * itemsize)) // _LANE * _LANE)
        if t <= max_t:
            block_t = t
            # Split along T for megacore only if there is enough data.
            if t >= 2 * _LANE and n * itemsize >= (2 << 20):
                cand = _round_up(pl.cdiv(t, 2), _LANE)
                if cand < t:
                    block_t = cand
        else:
            block_t = max_t
        grid = (pl.cdiv(b, block_b), pl.cdiv(t, block_t))
        out2d = _run_2d(x2d, (block_b, block_t), grid,
                        vmem_limit_bytes=vmem_limit_bytes, n_elems=n)

    # timesteps = min(T, T) == T -> no further truncation needed for pcm16.
    return out2d.reshape(b, 1, t)


def _reference(x):
    q = jnp.clip(jnp.round(x * _PCM_SCALE), _PCM_MIN, _PCM_MAX)
    return q / _PCM_SCALE


if __name__ == "__main__":
    key = jax.random.PRNGKey(0)
    cases = [
        # misaligned length -> (B, T) path, single block
        ((2, 1, 15987), {}),
        # aligned length -> flat lane-dense (rows, 128) path
        ((2, 1, 16384), {}),
        # misaligned + tiny blocks -> tiled with masked trailing lane-block
        ((2, 1, 15987), dict(target_block_bytes=64 << 10)),
        # aligned + tiny blocks -> flat path with masked trailing row-block
        ((3, 1, 13440), dict(target_block_bytes=64 << 10)),
    ]
    for idx, (shape, kwargs) in enumerate(cases):
        key, sub = jax.random.split(key)
        x = jax.random.uniform(sub, shape, dtype=jnp.float32,
                               minval=-1.0, maxval=1.0)
        x_hat = codec_augmentation_pcm16(x, **kwargs)
        jax.block_until_ready(x_hat)
        ref = _reference(x)
        assert x_hat.shape == x.shape, f"shape mismatch in case {idx}"
        assert x_hat.dtype == x.dtype, f"dtype mismatch in case {idx}"
        assert jnp.allclose(x_hat, ref, atol=1e-6), f"value mismatch in case {idx}"

    print("KERNEL_OK")
</pallas_src>

<mosaic_0001>
module attributes {stable_mosaic.version = 11 : i64} {
  func.func @_pcm16_kernel(%arg0: i32, %arg1: i32, %arg2: memref<2x15987xf32, #tpu.memory_space<vmem>>, %arg3: memref<2x15987xf32, #tpu.memory_space<vmem>>) attributes {dimension_semantics = [#tpu.dimension_semantics<parallel>, #tpu.dimension_semantics<parallel>], iteration_bounds = array<i64: 1, 1>, scalar_prefetch = 0 : i64, scratch_operands = 0 : i64, tpu.core_type = #tpu.core_type<tc>, window_params = [{transform_indices = @transform_0, window_bounds = array<i64: 2, 15987>}, {transform_indices = @transform_1, window_bounds = array<i64: 2, 15987>}]} {
    %c0 = arith.constant 0 : index
    %c0_0 = arith.constant 0 : index
    %0 = vector.load %arg2[%c0, %c0_0] : memref<2x15987xf32, #tpu.memory_space<vmem>>, vector<2x15987xf32>
    %cst = arith.constant 3.276800e+04 : f32
    %1 = vector.broadcast %cst : f32 to vector<2x15987xf32>
    %2 = arith.mulf %0, %1 : vector<2x15987xf32>
    %3 = math.roundeven %2 : vector<2x15987xf32>
    %cst_1 = arith.constant -3.276800e+04 : f32
    %cst_2 = arith.constant 3.276700e+04 : f32
    %4 = vector.broadcast %cst_1 : f32 to vector<2x15987xf32>
    %5 = arith.maximumf %4, %3 : vector<2x15987xf32>
    %6 = vector.broadcast %cst_2 : f32 to vector<2x15987xf32>
    %7 = arith.minimumf %6, %5 : vector<2x15987xf32>
    %cst_3 = arith.constant 3.05175781E-5 : f32
    %8 = vector.broadcast %cst_3 : f32 to vector<2x15987xf32>
    %9 = arith.mulf %7, %8 : vector<2x15987xf32>
    %c0_4 = arith.constant 0 : index
    %c0_5 = arith.constant 0 : index
    %10 = vector.load %arg3[%c0_4, %c0_5] : memref<2x15987xf32, #tpu.memory_space<vmem>>, vector<2x15987xf32>
    tpu.vector_store %arg3[%c0_4, %c0_5], %9 {strides = array<i32>} : memref<2x15987xf32, #tpu.memory_space<vmem>>, vector<2x15987xf32>,
    return
  }
  func.func @transform_0(%arg0: i32, %arg1: i32) -> (i32, i32) {
    %c0_i32 = arith.constant 0 : i32
    return %arg0, %arg1 : i32, i32
  }
  func.func @transform_1(%arg0: i32, %arg1: i32) -> (i32, i32) {
    %c0_i32 = arith.constant 0 : i32
    return %arg0, %arg1 : i32, i32
  }
}

</mosaic_0001>

<bundles_post_ra>
// kernel: tpu_custom_call.1
= control target key start
LH: loop header
LB: loop body
LE: loop exit
PB: predicated region body
PF: predicated region fallthrough
CT: control target
= control target key end

     0   :  { %6 = vsyncpa [#allocation3], 0  ;;  %s379_s0 = inlined_call_operand.hbm [shape: f32[2,15987], index: 0, kind: input, shape index: {}]   ;;  %s380_s1 = inlined_call_operand.hbm [shape: f32[2,15987], index: 1, kind: output, shape index: {}]  }
   0x1   :  { %7 = vsyncpa [#allocation4], 0  ;;  %s343_s6 = smov [#allocation2]   ;;  %s295_s10 = scalar_lea.hbm %s379_s0, 4000 }
   0x2   :  { %s14_s7 = sshll.u32 %s343_s6, 4  ;;  %p296_p0 = scmp.ne.s32.totalorder %s379_s0, %s295_s10  ;;  %s15_s7 = int_to_ptr.vmem [resolvable:$true] %s14_s7 }
   0x3   :  { %p299_p1 = scmp.lt.u32.totalorder %s295_s10, %s379_s0 }
   0x5   :  { %p301_p2 = pnand %p299_p1, %p296_p0 }
   0x7   :  { %304 = shalt.err (!%p301_p2)
}
   0x8   :  { %s305_s15 = scalar_lea.vmem %s15_s7, 4000  ;;  %p310_p4 = scmp.lt.s32.totalorder %s15_s7, %s15_s7 }
   0x9   :  { %p306_p3 = scmp.ne.s32.totalorder %s15_s7, %s305_s15  ;;  %p311_p5 = scmp.lt.s32.totalorder %s305_s15, %s305_s15 }
   0xb   :  { %p312_p6 = por %p311_p5, %p310_p4 }
   0xd   :  { %p313_p7 = pnand %p312_p6, %p306_p3 }
   0xf   :  { %316 = shalt.err (!%p313_p7)
}
  0x10   :  { %17 = dma.hbm_to_vmem [thread:$0]  %s379_s0, 4000, %s15_s7, [#allocation3]  }
  0x11   :  { %339 = dma.done.wait [#allocation3], 4000  }
  0x12   :  { %340 = vsyncadd [#allocation3], 4294963296  ;;  %v21_v0 = vld [vmem:[#allocation2] sm:$0xff]  ;;  %v22_v1 = vld [vmem:[#allocation2 + $0x8] sm:$0xff]  ;;  %s344_s0 = smov [#allocation5]   ;;  %vm244_vm0 = vcmask 934912  }
  0x13   :  { %v23_v2 = vld [vmem:[#allocation2 + $0x10] sm:$0xff]  ;;  %v53_v3 = vmul.f32 32768.0, %v21_v0  ;;  %v54_v4 = vmul.f32 32768.0, %v22_v1  ;;  %v24_v6 = vld [vmem:[#allocation2 + $0x18] sm:$0xff]  ;;  %v25_v7 = vld [vmem:[#allocation2 + $0x20] sm:$0xff]  ;;  %s252_s18 = sshll.u32 %s344_s0, 4  ;;  %s253_s18 = int_to_ptr.vmem [resolvable:$true] %s252_s18 }
  0x14   :  { %v55_v5 = vmul.f32 32768.0, %v23_v2  ;;  %v26_v8 = vld [vmem:[#allocation2 + $0x28] sm:$0xff]  ;;  %v56_v9 = vmul.f32 32768.0, %v24_v6  ;;  %v57_v10 = vmul.f32 32768.0, %v25_v7  ;;  %v27_v12 = vld [vmem:[#allocation2 + $0x30] sm:$0xff]  ;;  %v28_v13 = vld [vmem:[#allocation2 + $0x38] sm:$0xff]  ;;  %p322_p9 = scmp.lt.s32.totalorder %s253_s18, %s253_s18 }
  0x15   :  { %v58_v11 = vmul.f32 32768.0, %v26_v8  ;;  %v261_v14 = vround.rtne.f32 %v53_v3  ;;  %v262_v15 = vround.rtne.f32 %v54_v4  ;;  %v59_v17 = vmul.f32 32768.0, %v27_v12  ;;  %v29_v30 = vld [vmem:[#allocation2 + $0x40] sm:$0xff]  ;;  %v30_v31 = vld [vmem:[#allocation2 + $0x48] sm:$0xff]  ;;  %v31_v32 = vld [vmem:[#allocation2 + $0x50] sm:$0xff]  ;;  %s317_s19 = scalar_lea.vmem %s253_s18, 4000 }
  0x16   :  { %v263_v16 = vround.rtne.f32 %v55_v5  ;;  %v264_v18 = vround.rtne.f32 %v56_v9  ;;  %v265_v19 = vround.rtne.f32 %v57_v10  ;;  %v60_v21 = vmul.f32 32768.0, %v28_v13  ;;  %v32_v36 = vld [vmem:[#allocation2 + $0x58] sm:$0xff]  ;;  %v33_v44 = vld [vmem:[#allocation2 + $0x60] sm:$0xff]  ;;  %v34_v45 = vld [vmem:[#allocation2 + $0x68] sm:$0xff]  ;;  %p318_p8 = scmp.ne.s32.totalorder %s253_s18, %s317_s19  ;;  %p323_p10 = scmp.lt.s32.totalorder %s317_s19, %s317_s19 }
  0x17   :  { %v266_v20 = vround.rtne.f32 %v58_v11  ;;  %v117_v22 = vmax.f32 %v261_v14, -32768.0  ;;  %v118_v23 = vmax.f32 %v262_v15, -32768.0  ;;  %v267_v25 = vround.rtne.f32 %v59_v17  ;;  %v35_v58 = vld [vmem:[#allocation2 + $0x70] sm:$0xff]  ;;  %v36_v63 = vld [vmem:[#allocation2 + $0x78] sm:$0xff]  ;;  %v37_v12 = vld [vmem:[#allocation2 + $0x80] sm:$0xff] }
  0x18   :  { %v119_v24 = vmax.f32 %v263_v16, -32768.0  ;;  %v120_v26 = vmax.f32 %v264_v18, -32768.0  ;;  %v121_v27 = vmax.f32 %v265_v19, -32768.0  ;;  %v268_v29 = vround.rtne.f32 %v60_v21  ;;  %v38_v13 = vld [vmem:[#allocation2 + $0x88] sm:$0xff]  ;;  %v39_v14 = vld [vmem:[#allocation2 + $0x90] sm:$0xff]  ;;  %v40_v19 = vld [vmem:[#allocation2 + $0x98] sm:$0xff]  ;;  %p324_p11 = por %p323_p10, %p322_p9 }
  0x19   :  { %v122_v28 = vmax.f32 %v266_v20, -32768.0  ;;  %v149_v33 = vmin.f32 %v117_v22, 32767.0  ;;  %v150_v34 = vmin.f32 %v118_v23, 32767.0  ;;  %v123_v43 = vmax.f32 %v267_v25, -32768.0 }
  0x1a   :  { %v151_v35 = vmin.f32 %v119_v24, 32767.0  ;;  %v152_v37 = vmin.f32 %v120_v26, 32767.0  ;;  %v153_v38 = vmin.f32 %v121_v27, 32767.0  ;;  %p325_p12 = pnand %p324_p11, %p318_p8 }
  0x1b   :  { %v154_v39 = vmin.f32 %v122_v28, 32767.0  ;;  %v181_v40 = vmul.f32 3.0517578e-05, %v149_v33  ;;  %v182_v41 = vmul.f32 3.0517578e-05, %v150_v34  ;;  %v124_v49 = vmax.f32 %v268_v29, -32768.0  ;;  %v41_v28 = vld [vmem:[#allocation2 + $0xa0] sm:$0xff] }
  0x1c   :  { %v183_v42 = vmul.f32 3.0517578e-05, %v151_v35  ;;  %v184_v46 = vmul.f32 3.0517578e-05, %v152_v37  ;;  %v185_v47 = vmul.f32 3.0517578e-05, %v153_v38  ;;  %v155_v50 = vmin.f32 %v123_v43, 32767.0  ;;  %v42_v29 = vld [vmem:[#allocation2 + $0xa8] sm:$0xff] }
  0x1d   :  { %v186_v48 = vmul.f32 3.0517578e-05, %v154_v39  ;;  %213 = vst [vmem:[#allocation5] sm:$0xff] %v181_v40  ;;  %214 = vst [vmem:[#allocation5 + $0x8] sm:$0xff] %v182_v41  ;;  %v61_v51 = vmul.f32 32768.0, %v29_v30  ;;  %v62_v52 = vmul.f32 32768.0, %v30_v31  ;;  %v63_v53 = vmul.f32 32768.0, %v31_v32 }
  0x1e   :  { %215 = vst [vmem:[#allocation5 + $0x10] sm:$0xff] %v183_v42  ;;  %216 = vst [vmem:[#allocation5 + $0x18] sm:$0xff] %v184_v46  ;;  %v156_v54 = vmin.f32 %v124_v49, 32767.0  ;;  %v64_v55 = vmul.f32 32768.0, %v32_v36  ;;  %v65_v56 = vmul.f32 32768.0, %v33_v44 }
  0x1f   :  { %217 = vst [vmem:[#allocation5 + $0x20] sm:$0xff] %v185_v47  ;;  %218 = vst [vmem:[#allocation5 + $0x28] sm:$0xff] %v186_v48  ;;  %v66_v57 = vmul.f32 32768.0, %v34_v45  ;;  %v187_v59 = vmul.f32 3.0517578e-05, %v155_v50  ;;  %v269_v60 = vround.rtne.f32 %v61_v51  ;;  %v270_v61 = vround.rtne.f32 %v62_v52  ;;  %v43_v42 = vld [vmem:[#allocation2 + $0xb0] sm:$0xff]  ;;  %v44_v47 = vld [vmem:[#allocation2 + $0xb8] sm:$0xff] }
  0x20   :  { %v271_v62 = vround.rtne.f32 %v63_v53  ;;  %v188_v0 = vmul.f32 3.0517578e-05, %v156_v54  ;;  %v272_v1 = vround.rtne.f32 %v64_v55  ;;  %v273_v2 = vround.rtne.f32 %v65_v56 }
  0x21   :  { %v274_v3 = vround.rtne.f32 %v66_v57  ;;  %219 = vst [vmem:[#allocation5 + $0x30] sm:$0xff] %v187_v59  ;;  %v125_v4 = vmax.f32 %v269_v60, -32768.0  ;;  %v126_v5 = vmax.f32 %v270_v61, -32768.0  ;;  %v67_v7 = vmul.f32 32768.0, %v35_v58  ;;  %v45_v60 = vld [vmem:[#allocation2 + $0xc0] sm:$0xff]  ;;  %v46_v61 = vld [vmem:[#allocation2 + $0xc8] sm:$0xff] }
  0x22   :  { %v127_v6 = vmax.f32 %v271_v62, -32768.0  ;;  %220 = vst [vmem:[#allocation5 + $0x38] sm:$0xff] %v188_v0  ;;  %v128_v8 = vmax.f32 %v272_v1, -32768.0  ;;  %v129_v9 = vmax.f32 %v273_v2, -32768.0  ;;  %v68_v11 = vmul.f32 32768.0, %v36_v63  ;;  %v47_v62 = vld [vmem:[#allocation2 + $0xd0] sm:$0xff] }
  0x23   :  { %v130_v10 = vmax.f32 %v274_v3, -32768.0  ;;  %v157_v15 = vmin.f32 %v125_v4, 32767.0  ;;  %v158_v16 = vmin.f32 %v126_v5, 32767.0  ;;  %v275_v18 = vround.rtne.f32 %v67_v7  ;;  %v48_v3 = vld [vmem:[#allocation2 + $0xd8] sm:$0xff] }
  0x24   :  { %v159_v17 = vmin.f32 %v127_v6, 32767.0  ;;  %v160_v20 = vmin.f32 %v128_v8, 32767.0  ;;  %v161_v21 = vmin.f32 %v129_v9, 32767.0  ;;  %v276_v23 = vround.rtne.f32 %v68_v11 }
  0x25   :  { %v162_v22 = vmin.f32 %v130_v10, 32767.0  ;;  %v189_v24 = vmul.f32 3.0517578e-05, %v157_v15  ;;  %v190_v25 = vmul.f32 3.0517578e-05, %v158_v16  ;;  %v131_v27 = vmax.f32 %v275_v18, -32768.0 }
  0x26   :  { %v191_v26 = vmul.f32 3.0517578e-05, %v159_v17  ;;  %v192_v30 = vmul.f32 3.0517578e-05, %v160_v20  ;;  %v193_v31 = vmul.f32 3.0517578e-05, %v161_v21  ;;  %v132_v33 = vmax.f32 %v276_v23, -32768.0 }
  0x27   :  { %v194_v32 = vmul.f32 3.0517578e-05, %v162_v22  ;;  %221 = vst [vmem:[#allocation5 + $0x40] sm:$0xff] %v189_v24  ;;  %222 = vst [vmem:[#allocation5 + $0x48] sm:$0xff] %v190_v25  ;;  %v163_v34 = vmin.f32 %v131_v27, 32767.0  ;;  %v69_v35 = vmul.f32 32768.0, %v37_v12 }
  0x28   :  { %223 = vst [vmem:[#allocation5 + $0x50] sm:$0xff] %v191_v26  ;;  %v70_v36 = vmul.f32 32768.0, %v38_v13  ;;  %v71_v37 = vmul.f32 32768.0, %v39_v14  ;;  %224 = vst [vmem:[#allocation5 + $0x58] sm:$0xff] %v192_v30  ;;  %v164_v38 = vmin.f32 %v132_v33, 32767.0 }
  0x29   :  { %225 = vst [vmem:[#allocation5 + $0x60] sm:$0xff] %v193_v31  ;;  %226 = vst [vmem:[#allocation5 + $0x68] sm:$0xff] %v194_v32  ;;  %v72_v39 = vmul.f32 32768.0, %v40_v19  ;;  %v73_v40 = vmul.f32 32768.0, %v41_v28  ;;  %v74_v41 = vmul.f32 32768.0, %v42_v29  ;;  %v195_v43 = vmul.f32 3.0517578e-05, %v163_v34 }
  0x2a   :  { %v277_v44 = vround.rtne.f32 %v69_v35  ;;  %v278_v45 = vround.rtne.f32 %v70_v36  ;;  %v279_v46 = vround.rtne.f32 %v71_v37  ;;  %v196_v48 = vmul.f32 3.0517578e-05, %v164_v38  ;;  %v49_v12 = vld [vmem:[#allocation2 + $0xe0] sm:$0xff]  ;;  %v50_v13 = vld [vmem:[#allocation2 + $0xe8] sm:$0xff]  ;;  %v51_v26 = vld [vmem:[#allocation2 + $0xf0] sm:$0xff] }
  0x2b   :  { %v280_v49 = vround.rtne.f32 %v72_v39  ;;  %v281_v50 = vround.rtne.f32 %v73_v40  ;;  %v282_v51 = vround.rtne.f32 %v74_v41  ;;  %227 = vst [vmem:[#allocation5 + $0x70] sm:$0xff] %v195_v43  ;;  %v75_v55 = vmul.f32 32768.0, %v43_v42  ;;  %v52_v31 = vld [vmem:[#allocation2 + $0xf8] sm:$0x3] }
  0x2c   :  { %v133_v52 = vmax.f32 %v277_v44, -32768.0  ;;  %v134_v53 = vmax.f32 %v278_v45, -32768.0  ;;  %v135_v54 = vmax.f32 %v279_v46, -32768.0  ;;  %228 = vst [vmem:[#allocation5 + $0x78] sm:$0xff] %v196_v48  ;;  %v76_v59 = vmul.f32 32768.0, %v44_v47 }
  0x2d   :  { %v136_v56 = vmax.f32 %v280_v49, -32768.0  ;;  %v137_v57 = vmax.f32 %v281_v50, -32768.0  ;;  %v138_v58 = vmax.f32 %v282_v51, -32768.0  ;;  %v283_v2 = vround.rtne.f32 %v75_v55 }
  0x2e   :  { %v165_v63 = vmin.f32 %v133_v52, 32767.0  ;;  %v166_v0 = vmin.f32 %v134_v53, 32767.0  ;;  %v167_v1 = vmin.f32 %v135_v54, 32767.0  ;;  %v284_v7 = vround.rtne.f32 %v76_v59 }
  0x2f   :  { %v168_v4 = vmin.f32 %v136_v56, 32767.0  ;;  %v169_v5 = vmin.f32 %v137_v57, 32767.0  ;;  %v170_v6 = vmin.f32 %v138_v58, 32767.0 }
  0x30   :  { %v197_v8 = vmul.f32 3.0517578e-05, %v165_v63  ;;  %v198_v9 = vmul.f32 3.0517578e-05, %v166_v0  ;;  %v199_v10 = vmul.f32 3.0517578e-05, %v167_v1  ;;  %v139_v11 = vmax.f32 %v283_v2, -32768.0 }
  0x31   :  { %v200_v14 = vmul.f32 3.0517578e-05, %v168_v4  ;;  %v201_v15 = vmul.f32 3.0517578e-05, %v169_v5  ;;  %v202_v16 = vmul.f32 3.0517578e-05, %v170_v6  ;;  %v140_v17 = vmax.f32 %v284_v7, -32768.0 }
  0x32   :  { %229 = vst [vmem:[#allocation5 + $0x80] sm:$0xff] %v197_v8  ;;  %230 = vst [vmem:[#allocation5 + $0x88] sm:$0xff] %v198_v9  ;;  %v171_v18 = vmin.f32 %v139_v11, 32767.0  ;;  %v77_v19 = vmul.f32 32768.0, %v45_v60  ;;  %v78_v20 = vmul.f32 32768.0, %v46_v61 }
  0x33   :  { %231 = vst [vmem:[#allocation5 + $0x90] sm:$0xff] %v199_v10  ;;  %v79_v21 = vmul.f32 32768.0, %v47_v62  ;;  %232 = vst [vmem:[#allocation5 + $0x98] sm:$0xff] %v200_v14  ;;  %v172_v22 = vmin.f32 %v140_v17, 32767.0  ;;  %v80_v23 = vmul.f32 32768.0, %v48_v3 }
  0x34   :  { %233 = vst [vmem:[#allocation5 + $0xa0] sm:$0xff] %v201_v15  ;;  %234 = vst [vmem:[#allocation5 + $0xa8] sm:$0xff] %v202_v16  ;;  %v81_v24 = vmul.f32 32768.0, %v49_v12  ;;  %v82_v25 = vmul.f32 32768.0, %v50_v13  ;;  %v203_v27 = vmul.f32 3.0517578e-05, %v171_v18  ;;  %v285_v28 = vround.rtne.f32 %v77_v19 }
  0x35   :  { %v286_v29 = vround.rtne.f32 %v78_v20  ;;  %v287_v30 = vround.rtne.f32 %v79_v21  ;;  %v204_v32 = vmul.f32 3.0517578e-05, %v172_v22  ;;  %v288_v33 = vround.rtne.f32 %v80_v23 }
  0x36   :  { %v289_v34 = vround.rtne.f32 %v81_v24  ;;  %v290_v35 = vround.rtne.f32 %v82_v25  ;;  %235 = vst [vmem:[#allocation5 + $0xb0] sm:$0xff] %v203_v27  ;;  %v141_v36 = vmax.f32 %v285_v28, -32768.0  ;;  %v83_v39 = vmul.f32 32768.0, %v51_v26 }
  0x37   :  { %v142_v37 = vmax.f32 %v286_v29, -32768.0  ;;  %v143_v38 = vmax.f32 %v287_v30, -32768.0  ;;  %236 = vst [vmem:[#allocation5 + $0xb8] sm:$0xff] %v204_v32  ;;  %v144_v40 = vmax.f32 %v288_v33, -32768.0  ;;  %v84_v43 = vmul.f32 32768.0, %v52_v31 }
  0x38   :  { %v145_v41 = vmax.f32 %v289_v34, -32768.0  ;;  %v146_v42 = vmax.f32 %v290_v35, -32768.0  ;;  %v173_v44 = vmin.f32 %v141_v36, 32767.0  ;;  %v291_v47 = vround.rtne.f32 %v83_v39 }
  0x39   :  { %v174_v45 = vmin.f32 %v142_v37, 32767.0  ;;  %v175_v46 = vmin.f32 %v143_v38, 32767.0  ;;  %v176_v48 = vmin.f32 %v144_v40, 32767.0  ;;  %v292_v51 = vround.rtne.f32 %v84_v43 }
  0x3a   :  { %v177_v49 = vmin.f32 %v145_v41, 32767.0  ;;  %v178_v50 = vmin.f32 %v146_v42, 32767.0  ;;  %v205_v52 = vmul.f32 3.0517578e-05, %v173_v44  ;;  %v147_v55 = vmax.f32 %v291_v47, -32768.0 }
  0x3b   :  { %v206_v53 = vmul.f32 3.0517578e-05, %v174_v45  ;;  %v207_v54 = vmul.f32 3.0517578e-05, %v175_v46  ;;  %v208_v56 = vmul.f32 3.0517578e-05, %v176_v48  ;;  %v148_v59 = vmax.f32 %v292_v51, -32768.0 }
  0x3c   :  { %v209_v57 = vmul.f32 3.0517578e-05, %v177_v49  ;;  %v210_v58 = vmul.f32 3.0517578e-05, %v178_v50  ;;  %237 = vst [vmem:[#allocation5 + $0xc0] sm:$0xff] %v205_v52  ;;  %v179_v60 = vmin.f32 %v147_v55, 32767.0 }
  0x3d   :  { %238 = vst [vmem:[#allocation5 + $0xc8] sm:$0xff] %v206_v53  ;;  %239 = vst [vmem:[#allocation5 + $0xd0] sm:$0xff] %v207_v54  ;;  %v180_v61 = vmin.f32 %v148_v59, 32767.0 }
  0x3e   :  { %240 = vst [vmem:[#allocation5 + $0xd8] sm:$0xff] %v208_v56  ;;  %241 = vst [vmem:[#allocation5 + $0xe0] sm:$0xff] %v209_v57  ;;  %v211_v62 = vmul.f32 3.0517578e-05, %v179_v60 }
  0x3f   :  { %242 = vst [vmem:[#allocation5 + $0xe8] sm:$0xff] %v210_v58  ;;  %v212_v63 = vmul.f32 3.0517578e-05, %v180_v61 }
  0x40   :  { %243 = vst [vmem:[#allocation5 + $0xf0] sm:$0xff] %v211_v62 }
  0x41   :  { %245 = vst.msk [vmem:[#allocation5 + $0xf8] sm:$0x3] %vm244_vm0, %v212_v63 }
  0x42   :  { %328 = shalt.err (!%p325_p12)
}
  0x43   :  { %s329_s22 = scalar_lea.hbm %s380_s1, 4000 }
  0x44   :  { %p330_p13 = scmp.ne.s32.totalorder %s380_s1, %s329_s22  ;;  %p333_p0 = scmp.lt.u32.totalorder %s329_s22, %s380_s1 }
  0x46   :  { %p335_p1 = pnand %p333_p0, %p330_p13 }
  0x48   :  { %338 = shalt.err (!%p335_p1)
}
  0x49   :  { %255 = dma.vmem_to_hbm [thread:$0]  %s253_s18, 4000, %s380_s1, [#allocation4]  }
  0x4a   :  { %341 = dma.done.wait [#allocation4], 4000  }
  0x4b   :  { %342 = vsyncadd [#allocation4], 4294963296 }
  0x4c   :  { %259 = vsyncpa [#allocation3], 1 }
  0x4d   :  { %260 = vsyncpa [#allocation4], 1 }

</bundles_post_ra>
